<compile_context>
chip_gen: v5e
topology: v5e:2x2
jax: 0.10.0
libtpu: 0.0.40
codegen_flags: <defaults>
</compile_context>

<pallas_src>
import math
import functools

import jax
import jax.numpy as jnp
from jax import lax
from jax.experimental import pallas as pl
from jax.experimental.pallas import tpu as pltpu


def _flash_attn_kernel(recip_ref, seed_ref, q_ref, k_ref, v_ref, o_ref,
                       m_sc, l_sc, acc_sc, *, p):
    # recip_ref : SMEM f32[1]  -> 1.0 / inv_scale_factor (precomputed)
    # seed_ref  : SMEM i32[1]  -> dropout seed
    # q_ref     : VMEM f32[tq, D]   (current batch / q-tile)
    # k_ref/v_ref: VMEM f32[tk, D]  (current batch / k-tile)
    # o_ref     : VMEM f32[tq, D]
    # m_sc/l_sc : VMEM f32[tq, 1]   online-softmax max / denom accumulators
    # acc_sc    : VMEM f32[tq, D]   output accumulator
    b = pl.program_id(0)
    qi = pl.program_id(1)
    ki = pl.program_id(2)
    nq = pl.num_programs(1)
    nk = pl.num_programs(2)

    @pl.when(ki == 0)
    def _():
        m_sc[...] = jnp.full_like(m_sc, -jnp.inf)
        l_sc[...] = jnp.zeros_like(l_sc)
        acc_sc[...] = jnp.zeros_like(acc_sc)

    # Fold the scale into q: (q * (1/inv_scale)) @ k^T  == (q @ k^T) / inv_scale
    q = q_ref[...] * recip_ref[0]
    # Contract the last dims directly (no k transpose).  Keep f32 for logits.
    s = lax.dot_general(q, k_ref[...], (((1,), (1,)), ((), ())),
                        preferred_element_type=jnp.float32)

    m_prev = m_sc[...]
    m_new = jnp.maximum(m_prev, jnp.max(s, axis=-1, keepdims=True))
    alpha = jnp.exp(m_prev - m_new)
    e = jnp.exp(s - m_new)

    # Row-sum accumulates the FULL (pre-dropout) exp sum: torch normalizes
    # before applying dropout.
    l_sc[...] = alpha * l_sc[...] + jnp.sum(e, axis=-1, keepdims=True)

    if p > 0.0:
        # Independent PRNG stream per (batch, q-tile, k-tile).
        pltpu.prng_seed(seed_ref[0] + (b * nq + qi) * nk + ki)
        bits = pltpu.bitcast(pltpu.prng_random_bits(e.shape), jnp.uint32)
        threshold = jnp.uint32(min(int(p * 4294967296.0), 4294967295))
        keep = bits >= threshold
        e_d = jnp.where(keep, e * (1.0 / (1.0 - p)), 0.0)
    else:
        e_d = e

    # probs @ v on the MXU in bf16 with f32 accumulation.
    acc_sc[...] = alpha * acc_sc[...] + jnp.dot(
        e_d.astype(jnp.bfloat16), v_ref[...].astype(jnp.bfloat16),
        preferred_element_type=jnp.float32)
    m_sc[...] = m_new

    @pl.when(ki == nk - 1)
    def _():
        o_ref[...] = (acc_sc[...] *
                      pl.reciprocal(l_sc[...], approx=True)).astype(o_ref.dtype)


def attention_dropout(q, k, v, inv_scale_factor, p, *,
                      dropout_seed=0, tq=128, tk=128):
    """q, k, v: (B, S, D) float32.  Returns (B, S, D) float32."""
    B, S, D = q.shape
    assert k.shape == (B, S, D) and v.shape == (B, S, D)
    assert 0.0 <= float(p) < 1.0, "dropout p must be in [0, 1)"

    tq = min(tq, S)
    tk = min(tk, S)
    assert S % tq == 0 and S % tk == 0
    nq, nk = S // tq, S // tk

    recip = jnp.asarray([1.0 / float(inv_scale_factor)], dtype=jnp.float32)
    seed = jnp.asarray([int(dropout_seed)], dtype=jnp.int32)
    kernel = functools.partial(_flash_attn_kernel, p=float(p))

    grid_spec = pltpu.PrefetchScalarGridSpec(
        num_scalar_prefetch=2,            # recip + seed land in SMEM
        grid=(B, nq, nk),
        in_specs=[
            pl.BlockSpec((None, tq, D), lambda b, qi, ki, rc, sd: (b, qi, 0)),  # q
            pl.BlockSpec((None, tk, D), lambda b, qi, ki, rc, sd: (b, ki, 0)),  # k
            pl.BlockSpec((None, tk, D), lambda b, qi, ki, rc, sd: (b, ki, 0)),  # v
        ],
        out_specs=pl.BlockSpec((None, tq, D), lambda b, qi, ki, rc, sd: (b, qi, 0)),
        scratch_shapes=[
            pltpu.VMEM((tq, 1), jnp.float32),   # m (running max)
            pltpu.VMEM((tq, 1), jnp.float32),   # l (running denom)
            pltpu.VMEM((tq, D), jnp.float32),   # acc (running output)
        ],
    )

    return pl.pallas_call(
        kernel,
        out_shape=jax.ShapeDtypeStruct((B, S, D), jnp.float32),
        grid_spec=grid_spec,
        compiler_params=pltpu.CompilerParams(
            dimension_semantics=("parallel", "parallel", "arbitrary")),
    )(recip, seed, q, k, v)


def _reference(q, k, v, inv_scale_factor, p):
    # Pure-JAX reference (p must be 0 for a deterministic comparison).
    qk = jnp.einsum("bsd,btd->bst", q, k)
    scaled = qk / inv_scale_factor
    soft = jax.nn.softmax(scaled, axis=-1)
    return jnp.einsum("bst,btd->bsd", soft, v)


if __name__ == "__main__":
    B, S, D = 1, 128, 64
    key = jax.random.PRNGKey(0)
    kq, kk, kv = jax.random.split(key, 3)
    q = jax.random.normal(kq, (B, S, D), dtype=jnp.float32)
    k = jax.random.normal(kk, (B, S, D), dtype=jnp.float32)
    v = jax.random.normal(kv, (B, S, D), dtype=jnp.float32)

    inv_scale_factor = 1.0 / math.sqrt(128.0)
    p = 0.0  # deterministic run; kernel also supports 0 <= p < 1 via HW PRNG

    # tq/tk < S so the multi-tile online-softmax + pipelined path is exercised.
    out = attention_dropout(q, k, v, inv_scale_factor, p, tq=64, tk=64)
    out = jax.block_until_ready(out)

    ref = _reference(q, k, v, inv_scale_factor, p)
    assert out.shape == (B, S, D)
    # probs@v runs in bf16 (f32 accumulation) -> slightly looser tolerance.
    assert jnp.allclose(out, ref, atol=2e-2, rtol=2e-2)

    print("KERNEL_OK")
</pallas_src>

<mosaic_0001>
module attributes {stable_mosaic.version = 11 : i64} {
  func.func @_flash_attn_kernel(%arg0: i32, %arg1: i32, %arg2: i32, %arg3: memref<1xf32, #tpu.memory_space<smem>>, %arg4: memref<1xi32, #tpu.memory_space<smem>>, %arg5: memref<1x64x64xf32, #tpu.memory_space<vmem>>, %arg6: memref<1x64x64xf32, #tpu.memory_space<vmem>>, %arg7: memref<1x64x64xf32, #tpu.memory_space<vmem>>, %arg8: memref<1x64x64xf32, #tpu.memory_space<vmem>>, %arg9: memref<64x1xf32, #tpu.memory_space<vmem>>, %arg10: memref<64x1xf32, #tpu.memory_space<vmem>>, %arg11: memref<64x64xf32, #tpu.memory_space<vmem>>) attributes {dimension_semantics = [#tpu.dimension_semantics<parallel>, #tpu.dimension_semantics<parallel>, #tpu.dimension_semantics<arbitrary>], iteration_bounds = array<i64: 1, 2, 2>, scalar_prefetch = 2 : i64, scratch_operands = 3 : i64, tpu.core_type = #tpu.core_type<tc>, window_params = [{transform_indices = @transform_0, window_bounds = array<i64: 1, 64, 64>}, {transform_indices = @transform_1, window_bounds = array<i64: 1, 64, 64>}, {transform_indices = @transform_2, window_bounds = array<i64: 1, 64, 64>}, {transform_indices = @transform_3, window_bounds = array<i64: 1, 64, 64>}]} {
    %c0_i32 = arith.constant 0 : i32
    %0 = arith.cmpi eq, %arg2, %c0_i32 : i32
    %1 = arith.extui %0 : i1 to i32
    %c0_i32_0 = arith.constant 0 : i32
    %2 = arith.cmpi ne, %1, %c0_i32_0 : i32
    scf.if %2 {
      %cst_26 = arith.constant 0xFF800000 : f32
      %40 = vector.broadcast %cst_26 : f32 to vector<64x1xf32>
      %c0_27 = arith.constant 0 : index
      %c0_28 = arith.constant 0 : index
      %41 = vector.load %arg9[%c0_27, %c0_28] : memref<64x1xf32, #tpu.memory_space<vmem>>, vector<64x1xf32>
      tpu.vector_store %arg9[%c0_27, %c0_28], %40 {strides = array<i32>} : memref<64x1xf32, #tpu.memory_space<vmem>>, vector<64x1xf32>,
      %cst_29 = arith.constant 0.000000e+00 : f32
      %42 = vector.broadcast %cst_29 : f32 to vector<64x1xf32>
      %c0_30 = arith.constant 0 : index
      %c0_31 = arith.constant 0 : index
      %43 = vector.load %arg10[%c0_30, %c0_31] : memref<64x1xf32, #tpu.memory_space<vmem>>, vector<64x1xf32>
      tpu.vector_store %arg10[%c0_30, %c0_31], %42 {strides = array<i32>} : memref<64x1xf32, #tpu.memory_space<vmem>>, vector<64x1xf32>,
      %cst_32 = arith.constant 0.000000e+00 : f32
      %44 = vector.broadcast %cst_32 : f32 to vector<64x64xf32>
      %c0_33 = arith.constant 0 : index
      %c0_34 = arith.constant 0 : index
      %45 = vector.load %arg11[%c0_33, %c0_34] : memref<64x64xf32, #tpu.memory_space<vmem>>, vector<64x64xf32>
      tpu.vector_store %arg11[%c0_33, %c0_34], %44 {strides = array<i32>} : memref<64x64xf32, #tpu.memory_space<vmem>>, vector<64x64xf32>,
    } else {
    }
    %c0 = arith.constant 0 : index
    %c0_1 = arith.constant 0 : index
    %c0_2 = arith.constant 0 : index
    %3 = vector.load %arg5[%c0, %c0_1, %c0_2] : memref<1x64x64xf32, #tpu.memory_space<vmem>>, vector<1x64x64xf32>
    %4 = vector.shape_cast %3 : vector<1x64x64xf32> to vector<64x64xf32>
    %c0_3 = arith.constant 0 : index
    %5 = memref.load %arg3[%c0_3] : memref<1xf32, #tpu.memory_space<smem>>
    %6 = vector.broadcast %5 : f32 to vector<64x64xf32>
    %7 = arith.mulf %4, %6 : vector<64x64xf32>
    %c0_4 = arith.constant 0 : index
    %c0_5 = arith.constant 0 : index
    %c0_6 = arith.constant 0 : index
    %8 = vector.load %arg6[%c0_4, %c0_5, %c0_6] : memref<1x64x64xf32, #tpu.memory_space<vmem>>, vector<1x64x64xf32>
    %9 = vector.shape_cast %8 : vector<1x64x64xf32> to vector<64x64xf32>
    %cst = arith.constant dense<0.000000e+00> : vector<64x64xf32>
    %10 = tpu.matmul %7, %9, %cst {dimension_numbers = #tpu.dot_dimension_numbers<[1], [1], [0], [0], [0, 0, 1, 0], [], []>} : vector<64x64xf32>, vector<64x64xf32>, vector<64x64xf32> -> vector<64x64xf32>
    %c0_7 = arith.constant 0 : index
    %c0_8 = arith.constant 0 : index
    %11 = vector.load %arg9[%c0_7, %c0_8] : memref<64x1xf32, #tpu.memory_space<vmem>>, vector<64x1xf32>
    %cst_9 = arith.constant dense<0xFF800000> : vector<64xf32>
    %12 = vector.multi_reduction <maximumf>, %10, %cst_9 [1] : vector<64x64xf32> to vector<64xf32>
    %13 = vector.shape_cast %12 : vector<64xf32> to vector<64x1xf32>
    %14 = arith.maximumf %11, %13 : vector<64x1xf32>
    %15 = arith.subf %11, %14 : vector<64x1xf32>
    %16 = math.exp %15 : vector<64x1xf32>
    %17 = vector.broadcast %14 : vector<64x1xf32> to vector<64x64xf32>
    %18 = arith.subf %10, %17 : vector<64x64xf32>
    %19 = math.exp %18 : vector<64x64xf32>
    %c0_10 = arith.constant 0 : index
    %c0_11 = arith.constant 0 : index
    %20 = vector.load %arg10[%c0_10, %c0_11] : memref<64x1xf32, #tpu.memory_space<vmem>>, vector<64x1xf32>
    %21 = arith.mulf %16, %20 : vector<64x1xf32>
    %cst_12 = arith.constant dense<0.000000e+00> : vector<64xf32>
    %22 = vector.multi_reduction <add>, %19, %cst_12 [1] : vector<64x64xf32> to vector<64xf32>
    %23 = vector.shape_cast %22 : vector<64xf32> to vector<64x1xf32>
    %24 = arith.addf %21, %23 : vector<64x1xf32>
    %c0_13 = arith.constant 0 : index
    %c0_14 = arith.constant 0 : index
    %25 = vector.load %arg10[%c0_13, %c0_14] : memref<64x1xf32, #tpu.memory_space<vmem>>, vector<64x1xf32>
    tpu.vector_store %arg10[%c0_13, %c0_14], %24 {strides = array<i32>} : memref<64x1xf32, #tpu.memory_space<vmem>>, vector<64x1xf32>,
    %c0_15 = arith.constant 0 : index
    %c0_16 = arith.constant 0 : index
    %26 = vector.load %arg11[%c0_15, %c0_16] : memref<64x64xf32, #tpu.memory_space<vmem>>, vector<64x64xf32>
    %27 = vector.broadcast %16 : vector<64x1xf32> to vector<64x64xf32>
    %28 = arith.mulf %27, %26 : vector<64x64xf32>
    %29 = arith.truncf %19 : vector<64x64xf32> to vector<64x64xbf16>
    %c0_17 = arith.constant 0 : index
    %c0_18 = arith.constant 0 : index
    %c0_19 = arith.constant 0 : index
    %30 = vector.load %arg7[%c0_17, %c0_18, %c0_19] : memref<1x64x64xf32, #tpu.memory_space<vmem>>, vector<1x64x64xf32>
    %31 = vector.shape_cast %30 : vector<1x64x64xf32> to vector<64x64xf32>
    %32 = arith.truncf %31 : vector<64x64xf32> to vector<64x64xbf16>
    %cst_20 = arith.constant dense<0.000000e+00> : vector<64x64xf32>
    %33 = tpu.matmul %29, %32, %cst_20 {dimension_numbers = #tpu.dot_dimension_numbers<[1], [0], [0], [1], [0, 0, 1, 1], [], []>} : vector<64x64xbf16>, vector<64x64xbf16>, vector<64x64xf32> -> vector<64x64xf32>
    %34 = arith.addf %28, %33 : vector<64x64xf32>
    %c0_21 = arith.constant 0 : index
    %c0_22 = arith.constant 0 : index
    %35 = vector.load %arg11[%c0_21, %c0_22] : memref<64x64xf32, #tpu.memory_space<vmem>>, vector<64x64xf32>
    tpu.vector_store %arg11[%c0_21, %c0_22], %34 {strides = array<i32>} : memref<64x64xf32, #tpu.memory_space<vmem>>, vector<64x64xf32>,
    %c0_23 = arith.constant 0 : index
    %c0_24 = arith.constant 0 : index
    %36 = vector.load %arg9[%c0_23, %c0_24] : memref<64x1xf32, #tpu.memory_space<vmem>>, vector<64x1xf32>
    tpu.vector_store %arg9[%c0_23, %c0_24], %14 {strides = array<i32>} : memref<64x1xf32, #tpu.memory_space<vmem>>, vector<64x1xf32>,
    %c1_i32 = arith.constant 1 : i32
    %37 = arith.cmpi eq, %arg2, %c1_i32 : i32
    %38 = arith.extui %37 : i1 to i32
    %c0_i32_25 = arith.constant 0 : i32
    %39 = arith.cmpi ne, %38, %c0_i32_25 : i32
    scf.if %39 {
      %c0_26 = arith.constant 0 : index
      %c0_27 = arith.constant 0 : index
      %40 = vector.load %arg11[%c0_26, %c0_27] : memref<64x64xf32, #tpu.memory_space<vmem>>, vector<64x64xf32>
      %c0_28 = arith.constant 0 : index
      %c0_29 = arith.constant 0 : index
      %41 = vector.load %arg10[%c0_28, %c0_29] : memref<64x1xf32, #tpu.memory_space<vmem>>, vector<64x1xf32>
      %42 = tpu.reciprocal %41 {approx = true} : vector<64x1xf32> -> vector<64x1xf32>
      %43 = vector.broadcast %42 : vector<64x1xf32> to vector<64x64xf32>
      %44 = arith.mulf %40, %43 : vector<64x64xf32>
      %c0_30 = arith.constant 0 : index
      %c0_31 = arith.constant 0 : index
      %c0_32 = arith.constant 0 : index
      %45 = vector.load %arg8[%c0_30, %c0_31, %c0_32] : memref<1x64x64xf32, #tpu.memory_space<vmem>>, vector<1x64x64xf32>
      %46 = vector.shape_cast %45 : vector<1x64x64xf32> to vector<64x64xf32>
      %47 = vector.shape_cast %44 : vector<64x64xf32> to vector<1x64x64xf32>
      tpu.vector_store %arg8[%c0_30, %c0_31, %c0_32], %47 {strides = array<i32>} : memref<1x64x64xf32, #tpu.memory_space<vmem>>, vector<1x64x64xf32>,
    } else {
    }
    return
  }
  func.func @transform_0(%arg0: i32, %arg1: i32, %arg2: i32, %arg3: memref<1xf32, #tpu.memory_space<smem>>, %arg4: memref<1xi32, #tpu.memory_space<smem>>) -> (i32, i32, i32) {
    %c0_i32 = arith.constant 0 : i32
    %c0_i32_0 = arith.constant 0 : i32
    return %arg0, %arg1, %c0_i32 : i32, i32, i32
  }
  func.func @transform_1(%arg0: i32, %arg1: i32, %arg2: i32, %arg3: memref<1xf32, #tpu.memory_space<smem>>, %arg4: memref<1xi32, #tpu.memory_space<smem>>) -> (i32, i32, i32) {
    %c0_i32 = arith.constant 0 : i32
    %c0_i32_0 = arith.constant 0 : i32
    return %arg0, %arg2, %c0_i32 : i32, i32, i32
  }
  func.func @transform_2(%arg0: i32, %arg1: i32, %arg2: i32, %arg3: memref<1xf32, #tpu.memory_space<smem>>, %arg4: memref<1xi32, #tpu.memory_space<smem>>) -> (i32, i32, i32) {
    %c0_i32 = arith.constant 0 : i32
    %c0_i32_0 = arith.constant 0 : i32
    return %arg0, %arg2, %c0_i32 : i32, i32, i32
  }
  func.func @transform_3(%arg0: i32, %arg1: i32, %arg2: i32, %arg3: memref<1xf32, #tpu.memory_space<smem>>, %arg4: memref<1xi32, #tpu.memory_space<smem>>) -> (i32, i32, i32) {
    %c0_i32 = arith.constant 0 : i32
    %c0_i32_0 = arith.constant 0 : i32
    return %arg0, %arg1, %c0_i32 : i32, i32, i32
  }
}

</mosaic_0001>

<bundles_post_ra>
// kernel: tpu_custom_call.1
= control target key start
LH: loop header
LB: loop body
LE: loop exit
PB: predicated region body
PF: predicated region fallthrough
CT: control target
= control target key end

     0   :  { %s1199_s20 = smov 0   ;;  %s1201_s21 = smov 0   ;;  %s1491_s0 = inlined_call_operand.<no memory space> [shape: f32[1], index: 0, kind: input, shape index: {}]   ;;  %s1492_s1 = inlined_call_operand.<no memory space> [shape: s32[1], index: 1, kind: input, shape index: {}]   ;;  %s1493_s2 = inlined_call_operand.vmem [shape: f32[1,128,64], index: 2, kind: input, shape index: {}]   ;;  %s1494_s3 = inlined_call_operand.vmem [shape: f32[1,128,64], index: 3, kind: input, shape index: {}]   ;;  %s1495_s4 = inlined_call_operand.vmem [shape: f32[1,128,64], index: 4, kind: input, shape index: {}]   ;;  %s1496_s5 = inlined_call_operand.vmem [shape: f32[1,128,64], index: 5, kind: output, shape index: {}]  }
   0x1   :  { %10 = sst [smem:[#allocation6]] %s1491_s0  ;;  %s1203_s1 = smov 0  }
   0x2   :  { %s1205_s22 = smov 0   ;;  %s1207_s23 = smov 0  }
   0x3 LB: > { %s29_s0 = sadd.s32 1, %s1152_s1  ;;  %s32_s24 = sadd.s32 1, %s1156_s22  ;;  %s1160_s23 = sphi %s1207_s23, %s17_s23   ;;  %s1156_s22 = sphi %s1205_s22, %s1500_s22   ;;  %s1152_s1 = sphi %s1203_s1, %s1499_s1   ;;  %s1148_s21 = sphi %s1201_s21, %s1498_s21   ;;  %s1144_s20 = sphi %s1199_s20, %s1497_s20  }
   0x4   : > { %p30_p0 = scmp.ge.s32.totalorder %s29_s0, 2  ;;  %p979_p1 = scmp.ge.s32.totalorder %s1160_s23, 1 }
   0x5   : > { %p203_p2 = scmp.lt.s32.totalorder %s1160_s23, 5 }
   0x6   : > { %s1502_s0 = smov (%p30_p0, %s29_s0), 0  ;;  %s1504_s24 = smov (!%p30_p0, %s32_s24), %s1156_s22 }
   0x7   : > { %p204_p3 = pnand %p979_p1, %p203_p2  ;;  %p34_p4 = scmp.ge.s32.totalorder %s1504_s24, 2 }
   0x8   : > { %s980_s25 = sshll.u32 (!%p204_p3), %s1148_s21, 3  ;;  %s982_s26 = sshll.u32 (!%p204_p3), %s1144_s20, 3 }
   0x9   : > { %s1506_s24 = smov (%p34_p4, %s1504_s24), 0  ;;  %207 = sbr.rel (%p204_p3) target bundleno = 780 (0x30c), region = 32 }
   0xa   : > { %p256_p5 = scmp.lt.s32.totalorder (!%p204_p3), %s980_s25, 15  ;;  %p266_p6 = scmp.lt.s32.totalorder (!%p204_p3), %s982_s26, 15 }
   0xb   : > { %p988_p7 = scmp.ne.s32.totalorder (!%p204_p3), %s1144_s20, 0 }
   0xe   : > { %s1508_s25 = smov (!%p256_p5, %s980_s25), 15  ;;  %s1510_s26 = smov (!%p266_p6, %s982_s26), 15 }
   0xf   : > { %s981_s27 = sshll.u32 %s1508_s25, 3  ;;  %s983_s6 = sshll.u32 %s1510_s26, 3 }
  0x10   : > { %s1235_s30 = scalar_lea.vmem %s1493_s2, %s981_s27  ;;  %s1240_s9 = scalar_lea.vmem %s1494_s3, %s983_s6 }
  0x11   : > { %s1245_s12 = scalar_lea.vmem %s1495_s4, %s983_s6  ;;  %s1250_s15 = scalar_lea.vmem %s1496_s5, %s981_s27 }
  0x12   : > { %297 = sbr.rel (%p988_p7) target bundleno = 48 (0x30), region = 36 }
  0x17   : > { %vm298_vm0 = vcmask 7168   ;;  %v1162_v0 = vmov -inf   ;;  %v1163_v1 = vmov 0.0   ;;  %vm315_vm1 = vcmask 523264  }
  0x18   : > { %299 = vst.msk [vmem:[#allocation2] sm:$0xff] %vm298_vm0, %v1162_v0 }
  0x19   : > { %300 = vst.msk [vmem:[#allocation2 + $0x8] sm:$0xff] %vm298_vm0, %v1162_v0 }
  0x1a   : > { %301 = vst.msk [vmem:[#allocation2 + $0x10] sm:$0xff] %vm298_vm0, %v1162_v0 }
  0x1b   : > { %302 = vst.msk [vmem:[#allocation2 + $0x18] sm:$0xff] %vm298_vm0, %v1162_v0 }
  0x1c   : > { %303 = vst.msk [vmem:[#allocation2 + $0x20] sm:$0xff] %vm298_vm0, %v1162_v0 }
  0x1d   : > { %304 = vst.msk [vmem:[#allocation2 + $0x28] sm:$0xff] %vm298_vm0, %v1162_v0 }
  0x1e   : > { %305 = vst.msk [vmem:[#allocation2 + $0x30] sm:$0xff] %vm298_vm0, %v1162_v0 }
  0x1f   : > { %306 = vst.msk [vmem:[#allocation2 + $0x38] sm:$0xff] %vm298_vm0, %v1162_v0 }
  0x20   : > { %307 = vst.msk [vmem:[#allocation3] sm:$0xff] %vm298_vm0, %v1163_v1 }
  0x21   : > { %308 = vst.msk [vmem:[#allocation3 + $0x8] sm:$0xff] %vm298_vm0, %v1163_v1 }
  0x22   : > { %309 = vst.msk [vmem:[#allocation3 + $0x10] sm:$0xff] %vm298_vm0, %v1163_v1 }
  0x23   : > { %310 = vst.msk [vmem:[#allocation3 + $0x18] sm:$0xff] %vm298_vm0, %v1163_v1 }
  0x24   : > { %311 = vst.msk [vmem:[#allocation3 + $0x20] sm:$0xff] %vm298_vm0, %v1163_v1 }
  0x25   : > { %312 = vst.msk [vmem:[#allocation3 + $0x28] sm:$0xff] %vm298_vm0, %v1163_v1 }
  0x26   : > { %313 = vst.msk [vmem:[#allocation3 + $0x30] sm:$0xff] %vm298_vm0, %v1163_v1 }
  0x27   : > { %314 = vst.msk [vmem:[#allocation3 + $0x38] sm:$0xff] %vm298_vm0, %v1163_v1 }
  0x28   : > { %316 = vst.msk [vmem:[#allocation4] sm:$0xff] %vm315_vm1, %v1163_v1 }
  0x29   : > { %317 = vst.msk [vmem:[#allocation4 + $0x8] sm:$0xff] %vm315_vm1, %v1163_v1 }
  0x2a   : > { %318 = vst.msk [vmem:[#allocation4 + $0x10] sm:$0xff] %vm315_vm1, %v1163_v1 }
  0x2b   : > { %319 = vst.msk [vmem:[#allocation4 + $0x18] sm:$0xff] %vm315_vm1, %v1163_v1 }
  0x2c   : > { %320 = vst.msk [vmem:[#allocation4 + $0x20] sm:$0xff] %vm315_vm1, %v1163_v1 }
  0x2d   : > { %321 = vst.msk [vmem:[#allocation4 + $0x28] sm:$0xff] %vm315_vm1, %v1163_v1 }
  0x2e   : > { %322 = vst.msk [vmem:[#allocation4 + $0x30] sm:$0xff] %vm315_vm1, %v1163_v1 }
  0x2f   : > { %323 = vst.msk [vmem:[#allocation4 + $0x38] sm:$0xff] %vm315_vm1, %v1163_v1 }
  0x30 PF: > { %v349_v2 = vld [vmem:[%s1240_s9 + $0x38] sm:$0xff]  ;;  %vm350_vm2 = vcmask 523264   ;;  %v348_v3 = vld [vmem:[%s1240_s9 + $0x30] sm:$0xff]  ;;  %v347_v4 = vld [vmem:[%s1240_s9 + $0x28] sm:$0xff]  ;;  %s332_s16 = sld [smem:[#allocation6]]  ;;  %v1164_v43 = vmov 0  }
  0x31   : > { %989 = vmatpush.xpose.msk.msra.mxu0 %vm350_vm2, %v349_v2  ;;  %1012 = vmatpush.xpose.msk.msra.mxu2 %vm350_vm2, %v349_v2  ;;  %v346_v5 = vld [vmem:[%s1240_s9 + $0x20] sm:$0xff]  ;;  %v345_v6 = vld [vmem:[%s1240_s9 + $0x18] sm:$0xff]  ;;  %v344_v7 = vld [vmem:[%s1240_s9 + $0x10] sm:$0xff]  ;;  %vm616_vm3 = vcmask 7168   ;;  %p1009_p8 = scmp.ne.s32.totalorder %s1144_s20, 1 }
  0x32   : > { %v343_v8 = vld [vmem:[%s1240_s9 + $0x8] sm:$0xff]  ;;  %v324_v9 = vld [vmem:[%s1235_s30] sm:$0xff]  ;;  %v327_v11 = vld [vmem:[%s1235_s30 + $0x18] sm:$0xff]  ;;  %1069 = vset.pattern.permute.xlu0 %v1164_v43  ;;  %1070 = vset.pattern.permute.xlu1 %v1164_v43 }
  0x33   : > { %v342_v12 = vld [vmem:[%s1240_s9] sm:$0xff]  ;;  %v325_v15 = vld [vmem:[%s1235_s30 + $0x8] sm:$0xff]  ;;  %v326_v19 = vld [vmem:[%s1235_s30 + $0x10] sm:$0xff]  ;;  %1068 = vset.pattern.permute.xlu2 %v1164_v43 }
  0x34   : > { %v328_v16 = vld [vmem:[%s1235_s30 + $0x20] sm:$0xff]  ;;  %v329_v20 = vld [vmem:[%s1235_s30 + $0x28] sm:$0xff]  ;;  %v330_v23 = vld [vmem:[%s1235_s30 + $0x30] sm:$0xff] }
  0x35   : > { %990 = vmatpush.xpose.msk.msra.mxu0 %vm350_vm2, %v348_v3  ;;  %1013 = vmatpush.xpose.msk.msra.mxu2 %vm350_vm2, %v348_v3  ;;  %v331_v25 = vld [vmem:[%s1235_s30 + $0x38] sm:$0xff]  ;;  %v440_v44 = vld [vmem:[#allocation2] sm:$0xff]  ;;  %v441_v48 = vld [vmem:[#allocation2 + $0x8] sm:$0xff] }
  0x36   : > { %v333_v10 = vstv %s332_s16  ;;  %v443_v47 = vld [vmem:[#allocation2 + $0x18] sm:$0xff]  ;;  %v444_v53 = vld [vmem:[#allocation2 + $0x20] sm:$0xff]  ;;  %v442_v54 = vld [vmem:[#allocation2 + $0x10] sm:$0xff] }
  0x37   : > { %v334_v13 = vmul.f32 %v333_v10, %v324_v9  ;;  %v337_v14 = vmul.f32 %v333_v10, %v327_v11  ;;  %v335_v17 = vmul.f32 %v333_v10, %v325_v15  ;;  %v338_v18 = vmul.f32 %v333_v10, %v328_v16  ;;  %v1346_v61 = vld [vmem:[#allocation2 + $0x28] sm:$0xff]  ;;  %v1356_v3 = vld [vmem:[#allocation2 + $0x30] sm:$0xff]  ;;  %v1369_v9 = vld [vmem:[#allocation2 + $0x38] sm:$0xff] }
  0x38   : > { %v336_v21 = vmul.f32 %v333_v10, %v326_v19  ;;  %v339_v22 = vmul.f32 %v333_v10, %v329_v20  ;;  %v340_v24 = vmul.f32 %v333_v10, %v330_v23  ;;  %v341_v26 = vmul.f32 %v333_v10, %v331_v25  ;;  %v692_v23 = vld [vmem:[%s1245_s12 + $0x38] sm:$0xff]  ;;  %v689_v25 = vld [vmem:[%s1245_s12 + $0x20] sm:$0xff] }
  0x39   : > { %991 = vmatpush.xpose.msk.msra.mxu0 %vm350_vm2, %v347_v4  ;;  %1014 = vmatpush.xpose.msk.msra.mxu2 %vm350_vm2, %v347_v4 }
  0x3d   : > { %992 = vmatpush.xpose.msk.msra.mxu0 %vm350_vm2, %v346_v5  ;;  %1015 = vmatpush.xpose.msk.msra.mxu2 %vm350_vm2, %v346_v5 }
  0x41   : > { %993 = vmatpush.xpose.msk.msra.mxu0 %vm350_vm2, %v345_v6  ;;  %1016 = vmatpush.xpose.msk.msra.mxu2 %vm350_vm2, %v345_v6 }
  0x45   : > { %994 = vmatpush.xpose.msk.msra.mxu0 %vm350_vm2, %v344_v7  ;;  %1017 = vmatpush.xpose.msk.msra.mxu2 %vm350_vm2, %v344_v7 }
  0x49   : > { %995 = vmatpush.xpose.msk.msra.mxu0 %vm350_vm2, %v343_v8  ;;  %1018 = vmatpush.xpose.msk.msra.mxu2 %vm350_vm2, %v343_v8 }
  0x4d   : > { %996 = vmatpush.xpose.msk.msra.mxu0 %vm350_vm2, %v342_v12  ;;  %1019 = vmatpush.xpose.msk.msra.mxu2 %vm350_vm2, %v342_v12 }
  0x50   : > { %997 = vmatmul.msk.f32.vlgmr.msra.gmra.mxu0 %vm350_vm2, %v334_v13  ;;  %1000 = vmatmul.msk.f32.vlgmr.msra.gmra.mxu2 %vm350_vm2, %v337_v14 }
  0x58   : > { %998 = vmatmul.msk.f32.gmra.mxu0 %vm350_vm2, %v335_v17  ;;  %1001 = vmatmul.msk.f32.gmra.mxu2 %vm350_vm2, %v338_v18 }
  0x60   : > { %999 = vmatmul.msk.f32.gmra.mxu0 %vm350_vm2, %v336_v21  ;;  %1002 = vmatmul.msk.f32.gmra.mxu2 %vm350_vm2, %v339_v22  ;;  %v691_v22 = vld [vmem:[%s1245_s12 + $0x30] sm:$0xff] }
  0x68   : > { %1003 = vmatmul.msk.f32.gmra.mxu2 %vm350_vm2, %v340_v24  ;;  %v696_v24 = vpack.c.bf16 %v692_v23, %v691_v22 }
  0x6a   : > { %1020 = vmatpush.bf16.msra.mxu3 %v696_v24  ;;  %713 = vmatpush.bf16.msra.mxu1 %v696_v24 }
  0x70   : > { %1004 = vmatmul.msk.f32.gmra.mxu2 %vm350_vm2, %v341_v26  ;;  %v690_v26 = vld [vmem:[%s1245_s12 + $0x28] sm:$0xff] }
  0xcd   : > { %v1309_v27 = vpop.f32.mrf.mxu0 }
  0xce   : > { %v448_v28 = vsel %vm350_vm2, %v1309_v27, -inf }
  0xcf   : > { %449 = vmax.xlane.f32.xlu0 %v448_v28  ;;  %v695_v28 = vpack.c.bf16 %v690_v26, %v689_v25 }
  0xd1   : > { %1021 = vmatpush.bf16.msra.mxu3 %v695_v28  ;;  %714 = vmatpush.bf16.msra.mxu1 %v695_v28 }
  0xd3   : > { %v1313_v29 = vpop.f32.mrf.mxu2 }
  0xd4   : > { %v457_v31 = vsel %vm350_vm2, %v1313_v29, -inf }
  0xd5   : > { %v1315_v30 = vpop.f32.mrf.mxu0 }
  0xd6   : > { %v451_v32 = vsel %vm350_vm2, %v1315_v30, -inf }
  0xd7   : > { %458 = vmax.xlane.f32.xlu0 %v457_v31  ;;  %452 = vmax.xlane.f32.xlu1 %v451_v32  ;;  %v687_v31 = vld [vmem:[%s1245_s12 + $0x10] sm:$0xff]  ;;  %v688_v32 = vld [vmem:[%s1245_s12 + $0x18] sm:$0xff] }
  0xdb   : > { %v1321_v33 = vpop.f32.mrf.mxu2 }
  0xdc   : > { %v460_v35 = vsel %vm350_vm2, %v1321_v33, -inf }
  0xdd   : > { %v1323_v34 = vpop.f32.mrf.mxu0 }
  0xde   : > { %v454_v36 = vsel %vm350_vm2, %v1323_v34, -inf }
  0xdf   : > { %461 = vmax.xlane.f32.xlu1 %v460_v35  ;;  %455 = vmax.xlane.f32.xlu0 %v454_v36  ;;  %v694_v35 = vpack.c.bf16 %v688_v32, %v687_v31  ;;  %v685_v36 = vld [vmem:[%s1245_s12] sm:$0xff] }
  0xe1   : > { %1022 = vmatpush.bf16.msra.mxu3 %v694_v35  ;;  %715 = vmatpush.bf16.msra.mxu1 %v694_v35 }
  0xe3   : > { %v1329_v37 = vpop.f32.mrf.mxu2 }
  0xe4   : > { %v463_v38 = vsel %vm350_vm2, %v1329_v37, -inf }
  0xe7   : > { %464 = vmax.xlane.f32.xlu1 %v463_v38  ;;  %v686_v38 = vld [vmem:[%s1245_s12 + $0x8] sm:$0xff] }
  0xeb   : > { %v1333_v39 = vpop.f32.mrf.mxu2 }
  0xec   : > { %v466_v40 = vsel %vm350_vm2, %v1333_v39, -inf }
  0xed   : > { %467 = vmax.xlane.f32.xlu2 %v466_v40  ;;  %v693_v40 = vpack.c.bf16 %v686_v38, %v685_v36 }
  0xef   : > { %1023 = vmatpush.bf16.msra.mxu3 %v693_v40  ;;  %716 = vmatpush.bf16.msra.mxu1 %v693_v40 }
  0xf3   : > { %v1337_v41 = vpop.f32.mrf.mxu2 }
  0xf4   : > { %v469_v42 = vsel %vm350_vm2, %v1337_v41, -inf }
  0xf5   : > { %470 = vmax.xlane.f32.xlu2 %v469_v42 }
 0x142   : > { %v450_v45 = vpop.xlane.xlu0 %449 }
 0x143   : > { %v472_v46 = vmax.f32 %v440_v44, %v450_v45 }
 0x145   : > { %754 = vst.msk [vmem:[#allocation2] sm:$0xff] %vm616_vm3, %v472_v46  ;;  %v480_v15 = vsub.f32 %v440_v44, %v472_v46 }
 0x147   : > { %v488_v16 = vmul.f32 1.442695, %v480_v15 }
 0x14a   : > { %v459_v49 = vpop.xlane.xlu0 %458  ;;  %v453_v50 = vpop.xlane.xlu1 %452 }
 0x14b   : > { %v475_v51 = vmax.f32 %v443_v47, %v459_v49  ;;  %v473_v52 = vmax.f32 %v441_v48, %v453_v50 }
 0x14d   : > { %757 = vst.msk [vmem:[#allocation2 + $0x18] sm:$0xff] %vm616_vm3, %v475_v51  ;;  %521 = vperm.xlu0 %1069, %v475_v51   ;;  %v481_v8 = vsub.f32 %v441_v48, %v473_v52  ;;  %v483_v18 = vsub.f32 %v443_v47, %v475_v51 }
 0x14e   : > { %755 = vst.msk [vmem:[#allocation2 + $0x8] sm:$0xff] %vm616_vm3, %v473_v52 }
 0x14f   : > { %v490_v13 = vmul.f32 1.442695, %v481_v8  ;;  %v494_v19 = vmul.f32 1.442695, %v483_v18 }
 0x152   : > { %v462_v55 = vpop.xlane.xlu1 %461  ;;  %v456_v56 = vpop.xlane.xlu0 %455 }
 0x153   : > { %v476_v57 = vmax.f32 %v444_v53, %v462_v55  ;;  %v474_v58 = vmax.f32 %v442_v54, %v456_v56 }
 0x155   : > { %758 = vst.msk [vmem:[#allocation2 + $0x20] sm:$0xff] %vm616_vm3, %v476_v57  ;;  %v482_v59 = vsub.f32 %v442_v54, %v474_v58  ;;  %526 = vperm.xlu1 %1070, %v476_v57   ;;  %516 = vperm.xlu2 %1068, %v474_v58   ;;  %v484_v62 = vsub.f32 %v444_v53, %v476_v57 }
 0x156   : > { %756 = vst.msk [vmem:[#allocation2 + $0x10] sm:$0xff] %vm616_vm3, %v474_v58 }
 0x157   : > { %v492_v60 = vmul.f32 1.442695, %v482_v59  ;;  %v496_v2 = vmul.f32 1.442695, %v484_v62 }
 0x159   : > { %1071 = vpow2.f32 %v492_v60 }
 0x15a   : > { %v465_v63 = vpop.xlane.xlu1 %464  ;;  %1073 = vpow2.f32 %v496_v2 }
 0x15b   : > { %v1349_v0 = vmax.f32 %v1346_v61, %v465_v63  ;;  %1075 = vpow2.f32 %v490_v13 }
 0x15c   : > { %1077 = vpow2.f32 %v488_v16 }
 0x15d   : > { %v485_v1 = vsub.f32 %v1346_v61, %v1349_v0  ;;  %759 = vst.msk [vmem:[#allocation2 + $0x28] sm:$0xff] %vm616_vm3, %v1349_v0  ;;  %531 = vperm.xlu2 %1068, %v1349_v0   ;;  %1079 = vpow2.f32 %v494_v19  ;;  %v571_v0 = vld [vmem:[#allocation3 + $0x18] sm:$0xff] }
 0x15f   : > { %v1358_v4 = vpop.eup %1071  ;;  %v498_v32 = vmul.f32 1.442695, %v485_v1 }
 0x160   : > { %v468_v5 = vpop.xlane.xlu2 %467  ;;  %645 = vperm.xlu0 %1069, %v1358_v4   ;;  %v1371_v10 = vpop.eup %1073 }
 0x161   : > { %v1361_v6 = vmax.f32 %v1356_v3, %v468_v5  ;;  %v1382_v17 = vpop.eup %1075 }
 0x162   : > { %v1385_v20 = vpop.eup %1077 }
 0x163   : > { %v486_v7 = vsub.f32 %v1356_v3, %v1361_v6  ;;  %760 = vst.msk [vmem:[#allocation2 + $0x30] sm:$0xff] %vm616_vm3, %v1361_v6  ;;  %v1388_v21 = vpop.eup %1079 }
 0x164   : > { %v579_v1 = vmul.f32 %v1388_v21, %v571_v0 }
 0x165   : > { %536 = vperm.xlu2 %1068, %v1361_v6   ;;  %v500_v63 = vmul.f32 1.442695, %v486_v7 }
 0x168   : > { %v471_v11 = vpop.xlane.xlu2 %470  ;;  %655 = vperm.xlu0 %1069, %v1371_v10  }
 0x169   : > { %v1374_v12 = vmax.f32 %v1369_v9, %v471_v11 }
 0x16b   : > { %v487_v14 = vsub.f32 %v1369_v9, %v1374_v12  ;;  %761 = vst.msk [vmem:[#allocation2 + $0x38] sm:$0xff] %vm616_vm3, %v1374_v12  ;;  %541 = vperm.xlu1 %1070, %v1374_v12   ;;  %v570_v9 = vld [vmem:[#allocation3 + $0x10] sm:$0xff] }
 0x16c   : > { %v578_v12 = vmul.f32 %v1358_v4, %v570_v9  ;;  %v568_v4 = vld [vmem:[#allocation3] sm:$0xff] }
 0x16d   : > { %506 = vperm.xlu2 %1068, %v472_v46   ;;  %v502_v28 = vmul.f32 1.442695, %v487_v14 }
 0x173   : > { %511 = vperm.xlu1 %1070, %v473_v52  }
 0x175   : > { %640 = vperm.xlu2 %1068, %v1382_v17  }
 0x17b   : > { %635 = vperm.xlu1 %1070, %v1385_v20  }
 0x183   : > { %650 = vperm.xlu1 %1070, %v1388_v21  }
 0x1af   : > { %v517_v42 = vpop.permute.xlu2 %516 }
 0x1b0   : > { %v546_v43 = vsub.f32 %v1323_v34, %v517_v42  ;;  %v573_v42 = vld [vmem:[#allocation3 + $0x28] sm:$0xff] }
 0x1b2   : > { %v556_v44 = vmul.f32 1.442695, %v546_v43 }
 0x1b4   : > { %1081 = vpow2.f32 %v556_v44 }
 0x1b7   : > { %v532_v45 = vpop.permute.xlu2 %531 }
 0x1b8   : > { %v549_v46 = vsub.f32 %v1329_v37, %v532_v45 }
 0x1ba   : > { %v1082_v47 = vpop.eup %1081  ;;  %v562_v48 = vmul.f32 1.442695, %v549_v46 }
 0x1bb   : > { %v590_v49 = vsel %vm350_vm2, %v1082_v47, 0.0 }
 0x1bc   : > { %1083 = vpow2.f32 %v562_v48  ;;  %591 = vadd.xlane.f32.xlu1 %v590_v49 }
 0x1bf   : > { %v537_v50 = vpop.permute.xlu2 %536  ;;  %v522_v51 = vpop.permute.xlu0 %521 }
 0x1c0   : > { %v547_v52 = vsub.f32 %v1313_v29, %v522_v51  ;;  %v550_v13 = vsub.f32 %v1333_v39, %v537_v50  ;;  %v576_v50 = vmul.f32 %v1385_v20, %v568_v4 }
 0x1c2   : > { %v1084_v53 = vpop.eup %1083  ;;  %v558_v54 = vmul.f32 1.442695, %v547_v52  ;;  %v564_v7 = vmul.f32 1.442695, %v550_v13 }
 0x1c3   : > { %v599_v55 = vsel %vm350_vm2, %v1084_v53, 0.0 }
 0x1c4   : > { %600 = vadd.xlane.f32.xlu1 %v599_v55  ;;  %1085 = vpow2.f32 %v558_v54  ;;  %v627_v54 = vld [vmem:[#allocation4 + $0x10] sm:$0xff] }
 0x1c7   : > { %v507_v34 = vpop.permute.xlu2 %506  ;;  %v527_v56 = vpop.permute.xlu1 %526 }
 0x1c8   : > { %v544_v37 = vsub.f32 %v1309_v27, %v507_v34  ;;  %v548_v59 = vsub.f32 %v1321_v33, %v527_v56 }
 0x1ca   : > { %v552_v57 = vmul.f32 1.442695, %v544_v37  ;;  %v1086_v58 = vpop.eup %1085  ;;  %v560_v29 = vmul.f32 1.442695, %v548_v59 }
 0x1cb   : > { %v593_v60 = vsel %vm350_vm2, %v1086_v58, 0.0  ;;  %v682_v62 = vpack.c.bf16 %v1086_v58, %v1082_v47  ;;  %v628_v58 = vld [vmem:[#allocation4 + $0x18] sm:$0xff] }
 0x1cc   : > { %1087 = vpow2.f32 %v552_v57  ;;  %594 = vadd.xlane.f32.xlu2 %v593_v60  ;;  %v575_v60 = vld [vmem:[#allocation3 + $0x38] sm:$0xff] }
 0x1cd   : > { %1006 = vmatmul.msk.bf16.vlgmr.msra.gmra.mxu3 %vm350_vm2, %v682_v62  ;;  %1089 = vpow2.f32 %v560_v29 }
 0x1ce   : > { %1091 = vpow2.f32 %v500_v63  ;;  %v629_v63 = vld [vmem:[#allocation4 + $0x20] sm:$0xff] }
 0x1cf   : > { %v1435_v46 = vpop.permute.xlu2 %640 }
 0x1d2   : > { %v1088_v2 = vpop.eup %1087  ;;  %v646_v43 = vpop.permute.xlu0 %645 }
 0x1d3   : > { %v584_v27 = vsel %vm350_vm2, %v1088_v2, 0.0  ;;  %v1090_v5 = vpop.eup %1089  ;;  %v675_v34 = vmul.f32 %v646_v43, %v627_v54 }
 0x1d4   : > { %585 = vadd.xlane.f32.xlu0 %v584_v27  ;;  %v1412_v33 = vpop.eup %1091  ;;  %v596_v8 = vsel %vm350_vm2, %v1090_v5, 0.0  ;;  %v683_v11 = vpack.c.bf16 %v1084_v53, %v1090_v5  ;;  %v572_v53 = vld [vmem:[#allocation3 + $0x20] sm:$0xff] }
 0x1d5   : > { %v580_v55 = vmul.f32 %v1371_v10, %v572_v53 }
 0x1da   : > { %v656_v47 = vpop.permute.xlu0 %655 }
 0x1db   : > { %v677_v27 = vmul.f32 %v656_v47, %v629_v63 }
 0x1dc   : > { %597 = vadd.xlane.f32.xlu0 %v596_v8  ;;  %v569_v8 = vld [vmem:[#allocation3 + $0x8] sm:$0xff] }
 0x1dd   : > { %v542_v15 = vpop.permute.xlu1 %541  ;;  %665 = vperm.xlu1 %1070, %v1412_v33   ;;  %1007 = vmatmul.msk.bf16.gmra.mxu3 %vm350_vm2, %v683_v11  ;;  %v577_v13 = vmul.f32 %v1382_v17, %v569_v8 }
 0x1de   : > { %v551_v3 = vsub.f32 %v1337_v41, %v542_v15 }
 0x1e0   : > { %v566_v6 = vmul.f32 1.442695, %v551_v3 }
 0x1e2   : > { %1093 = vpow2.f32 %v566_v6 }
 0x1e3   : > { %1095 = vpow2.f32 %v564_v7  ;;  %v574_v7 = vld [vmem:[#allocation3 + $0x30] sm:$0xff] }
 0x1e5   : > { %v512_v16 = vpop.permute.xlu1 %511 }
 0x1e6   : > { %v545_v18 = vsub.f32 %v1315_v30, %v512_v16  ;;  %v625_v16 = vld [vmem:[#allocation4] sm:$0xff] }
 0x1e8   : > { %v1094_v19 = vpop.eup %1093  ;;  %v554_v22 = vmul.f32 1.442695, %v545_v18  ;;  %v582_v18 = vmul.f32 %v1412_v33, %v574_v7  ;;  %v632_v33 = vld [vmem:[#allocation4 + $0x38] sm:$0xff] }
 0x1e9   : > { %v605_v23 = vsel %vm350_vm2, %v1094_v19, 0.0  ;;  %v1096_v39 = vpop.eup %1095 }
 0x1ea   : > { %1097 = vpow2.f32 %v554_v22  ;;  %606 = vadd.xlane.f32.xlu0 %v605_v23  ;;  %v684_v24 = vpack.c.bf16 %v1094_v19, %v1096_v39  ;;  %v602_v30 = vsel %vm350_vm2, %v1096_v39, 0.0  ;;  %v631_v19 = vld [vmem:[#allocation4 + $0x30] sm:$0xff] }
 0x1eb   : > { %1099 = vpow2.f32 %v502_v28 }
 0x1ec   : > { %1101 = vpow2.f32 %v498_v32 }
 0x1ed   : > { %1008 = vmatmul.msk.bf16.gmra.mxu3 %vm350_vm2, %v684_v24  ;;  %v1431_v36 = vpop.permute.xlu1 %635 }
 0x1ee   : > { %v673_v24 = vmul.f32 %v1431_v36, %v625_v16 }
 0x1f0   : > { %v1098_v41 = vpop.eup %1097 }
 0x1f1   : > { %v587_v25 = vsel %vm350_vm2, %v1098_v41, 0.0  ;;  %v681_v26 = vpack.c.bf16 %v1098_v41, %v1088_v2  ;;  %v1100_v31 = vpop.eup %1099 }
 0x1f2   : > { %588 = vadd.xlane.f32.xlu2 %v587_v25  ;;  %v1102_v35 = vpop.eup %1101  ;;  %v583_v29 = vmul.f32 %v1100_v31, %v575_v60 }
 0x1f3   : > { %1005 = vmatmul.msk.bf16.vlgmr.msra.gmra.mxu1 %vm350_vm2, %v681_v26  ;;  %v581_v44 = vmul.f32 %v1102_v35, %v573_v42 }
 0x1f5   : > { %v651_v38 = vpop.permute.xlu1 %650 }
 0x1f6   : > { %v676_v59 = vmul.f32 %v651_v38, %v628_v58 }
 0x1fa   : > { %603 = vadd.xlane.f32.xlu2 %v602_v30  ;;  %v630_v30 = vld [vmem:[#allocation4 + $0x28] sm:$0xff] }
 0x1fe   : > { %670 = vperm.xlu0 %1069, %v1100_v31   ;;  %v626_v31 = vld [vmem:[#allocation4 + $0x8] sm:$0xff] }
 0x1ff   : > { %v674_v9 = vmul.f32 %v1435_v46, %v626_v31 }
 0x212   : > { %660 = vperm.xlu2 %1068, %v1102_v35  }
 0x22f   : > { %v592_v14 = vpop.xlane.xlu1 %591 }
 0x230   : > { %v610_v40 = vadd.f32 %v592_v14, %v578_v12 }
 0x232   : > { %619 = vst.msk [vmem:[#allocation3 + $0x10] sm:$0xff] %vm616_vm3, %v610_v40 }
 0x237   : > { %v601_v45 = vpop.xlane.xlu1 %600 }
 0x238   : > { %v613_v61 = vadd.f32 %v601_v45, %v581_v44 }
 0x23a   : > { %622 = vst.msk [vmem:[#allocation3 + $0x28] sm:$0xff] %vm616_vm3, %v613_v61 }
 0x23f   : > { %v595_v48 = vpop.xlane.xlu2 %594 }
 0x240   : > { %v611_v49 = vadd.f32 %v595_v48, %v579_v1 }
 0x242   : > { %620 = vst.msk [vmem:[#allocation3 + $0x18] sm:$0xff] %vm616_vm3, %v611_v49 }
 0x247   : > { %v586_v51 = vpop.xlane.xlu0 %585 }
 0x248   : > { %v608_v52 = vadd.f32 %v586_v51, %v576_v50 }
 0x24a   : > { %617 = vst.msk [vmem:[#allocation3] sm:$0xff] %vm616_vm3, %v608_v52 }
 0x24f   : > { %v598_v56 = vpop.xlane.xlu0 %597  ;;  %v666_v22 = vpop.permute.xlu1 %665 }
 0x250   : > { %v612_v37 = vadd.f32 %v598_v56, %v580_v55  ;;  %v723_v21 = vpop.f32.mrf.mxu3  ;;  %v679_v41 = vmul.f32 %v666_v22, %v631_v19 }
 0x251   : > { %v740_v57 = vadd.f32 %v723_v21, %v675_v34 }
 0x252   : > { %621 = vst.msk [vmem:[#allocation3 + $0x20] sm:$0xff] %vm616_vm3, %v612_v37 }
 0x253   : > { %748 = vst.msk [vmem:[#allocation4 + $0x10] sm:$0xff] %vm350_vm2, %v740_v57 }
 0x258   : > { %v725_v20 = vpop.f32.mrf.mxu3 }
 0x259   : > { %v741_v62 = vadd.f32 %v725_v20, %v676_v59 }
 0x25b   : > { %749 = vst.msk [vmem:[#allocation4 + $0x18] sm:$0xff] %vm350_vm2, %v741_v62 }
 0x25d   : > { %v607_v2 = vpop.xlane.xlu0 %606 }
 0x25e   : > { %v615_v10 = vadd.f32 %v607_v2, %v583_v29 }
 0x260   : > { %624 = vst.msk [vmem:[#allocation3 + $0x38] sm:$0xff] %vm616_vm3, %v615_v10  ;;  %v728_v5 = vpop.f32.mrf.mxu3 }
 0x261   : > { %v742_v11 = vadd.f32 %v728_v5, %v677_v27 }
 0x263   : > { %750 = vst.msk [vmem:[#allocation4 + $0x20] sm:$0xff] %vm350_vm2, %v742_v11 }
 0x265   : > { %v589_v15 = vpop.xlane.xlu2 %588 }
 0x266   : > { %v609_v3 = vadd.f32 %v589_v15, %v577_v13 }
 0x268   : > { %618 = vst.msk [vmem:[#allocation3 + $0x8] sm:$0xff] %vm616_vm3, %v609_v3  ;;  %v730_v6 = vpop.f32.mrf.mxu3 }
 0x26d   : > { %v604_v23 = vpop.xlane.xlu2 %603 }
 0x26e   : > { %v614_v39 = vadd.f32 %v604_v23, %v582_v18 }
 0x270   : > { %623 = vst.msk [vmem:[#allocation3 + $0x30] sm:$0xff] %vm616_vm3, %v614_v39  ;;  %v718_v25 = vpop.f32.mrf.mxu1  ;;  %v733_v26 = vpop.f32.mrf.mxu3 }
 0x271   : > { %v738_v17 = vadd.f32 %v718_v25, %v673_v24  ;;  %v744_v28 = vadd.f32 %v733_v26, %v679_v41  ;;  %v671_v32 = vpop.permute.xlu0 %670 }
 0x272   : > { %v680_v36 = vmul.f32 %v671_v32, %v632_v33 }
 0x273   : > { %746 = vst.msk [vmem:[#allocation4] sm:$0xff] %vm350_vm2, %v738_v17 }
 0x274   : > { %752 = vst.msk [vmem:[#allocation4 + $0x30] sm:$0xff] %vm350_vm2, %v744_v28 }
 0x275   : > { %v661_v35 = vpop.permute.xlu2 %660 }
 0x276   : > { %v678_v38 = vmul.f32 %v661_v35, %v630_v30 }
 0x278   : > { %v743_v12 = vadd.f32 %v730_v6, %v678_v38  ;;  %v720_v14 = vpop.f32.mrf.mxu1  ;;  %v735_v42 = vpop.f32.mrf.mxu3  ;;  %765 = sbr.rel (%p1009_p8) target bundleno = 780 (0x30c), region = 40 }
 0x279   : > { %v739_v40 = vadd.f32 %v720_v14, %v674_v9  ;;  %v745_v43 = vadd.f32 %v735_v42, %v680_v36 }
 0x27a   : > { %751 = vst.msk [vmem:[#allocation4 + $0x28] sm:$0xff] %vm350_vm2, %v743_v12 }
 0x27b   : > { %747 = vst.msk [vmem:[#allocation4 + $0x8] sm:$0xff] %vm350_vm2, %v739_v40 }
 0x27c   : > { %753 = vst.msk [vmem:[#allocation4 + $0x38] sm:$0xff] %vm350_vm2, %v745_v43 }
 0x27d   : > { %v776_v44 = vld [vmem:[#allocation3 + $0x10] sm:$0xff]  ;;  %v774_v45 = vld [vmem:[#allocation3] sm:$0xff]  ;;  %v1165_v61 = vmov 0   ;;  %v777_v46 = vld [vmem:[#allocation3 + $0x18] sm:$0xff] }
 0x27e   : > { %1104 = vset.pattern.permute.xlu1 %v1165_v61  ;;  %1103 = vset.pattern.permute.xlu0 %v1165_v61  ;;  %1106 = vrcp.f32 %v776_v44  ;;  %v778_v0 = vld [vmem:[#allocation3 + $0x20] sm:$0xff]  ;;  %v775_v1 = vld [vmem:[#allocation3 + $0x8] sm:$0xff]  ;;  %v781_v50 = vld [vmem:[#allocation3 + $0x38] sm:$0xff] }
 0x27f   : > { %1108 = vrcp.f32 %v774_v45  ;;  %1105 = vset.pattern.permute.xlu2 %v1165_v61  ;;  %v779_v49 = vld [vmem:[#allocation3 + $0x28] sm:$0xff]  ;;  %v780_v52 = vld [vmem:[#allocation3 + $0x30] sm:$0xff]  ;;  %v770_v56 = vld [vmem:[#allocation4 + $0x20] sm:$0xff] }
 0x280   : > { %1110 = vrcp.f32 %v777_v46  ;;  %v768_v20 = vld [vmem:[#allocation4 + $0x10] sm:$0xff]  ;;  %v766_v60 = vld [vmem:[#allocation4] sm:$0xff]  ;;  %v769_v10 = vld [vmem:[#allocation4 + $0x18] sm:$0xff] }
 0x281   : > { %1112 = vrcp.f32 %v778_v0  ;;  %v771_v57 = vld [vmem:[#allocation4 + $0x28] sm:$0xff]  ;;  %v772_v3 = vld [vmem:[#allocation4 + $0x30] sm:$0xff] }
 0x282   : > { %1114 = vrcp.f32 %v775_v1  ;;  %v767_v27 = vld [vmem:[#allocation4 + $0x8] sm:$0xff] }
 0x283   : > { %1116 = vrcp.f32 %v779_v49  ;;  %v773_v15 = vld [vmem:[#allocation4 + $0x38] sm:$0xff] }
 0x284   : > { %v1107_v47 = vpop.eup %1106  ;;  %1118 = vrcp.f32 %v781_v50 }
 0x285   : > { %v1109_v48 = vpop.eup %1108  ;;  %802 = vperm.xlu1 %1104, %v1107_v47   ;;  %1120 = vrcp.f32 %v780_v52 }
 0x286   : > { %792 = vperm.xlu0 %1103, %v1109_v48   ;;  %v1111_v4 = vpop.eup %1110 }
 0x287   : > { %v1113_v51 = vpop.eup %1112 }
 0x288   : > { %v1115_v53 = vpop.eup %1114  ;;  %812 = vperm.xlu2 %1105, %v1113_v51  }
 0x289   : > { %v1117_v54 = vpop.eup %1116 }
 0x28a   : > { %v1119_v55 = vpop.eup %1118 }
 0x28b   : > { %v1121_v34 = vpop.eup %1120 }
 0x28d   : > { %807 = vperm.xlu1 %1104, %v1111_v4  }
 0x28e   : > { %797 = vperm.xlu0 %1103, %v1115_v53  }
 0x290   : > { %817 = vperm.xlu2 %1105, %v1117_v54  }
 0x295   : > { %827 = vperm.xlu1 %1104, %v1119_v55  }
 0x296   : > { %822 = vperm.xlu0 %1103, %v1121_v34  }
 0x2e2   : > { %v813_v37 = vpop.permute.xlu2 %812 }
 0x2e3   : > { %v834_v21 = vmul.f32 %v813_v37, %v770_v56 }
 0x2e5   : > { %842 = vst.msk [vmem:[%s1250_s15 + $0x20] sm:$0xff] %vm350_vm2, %v834_v21 }
 0x2ea   : > { %v818_v58 = vpop.permute.xlu2 %817 }
 0x2eb   : > { %v835_v59 = vmul.f32 %v818_v58, %v771_v57 }
 0x2ed   : > { %843 = vst.msk [vmem:[%s1250_s15 + $0x28] sm:$0xff] %vm350_vm2, %v835_v59 }
 0x2f7   : > { %v803_v62 = vpop.permute.xlu1 %802 }
 0x2f8   : > { %v832_v29 = vmul.f32 %v803_v62, %v768_v20  ;;  %v793_v63 = vpop.permute.xlu0 %792 }
 0x2f9   : > { %v830_v2 = vmul.f32 %v793_v63, %v766_v60 }
 0x2fa   : > { %840 = vst.msk [vmem:[%s1250_s15 + $0x10] sm:$0xff] %vm350_vm2, %v832_v29 }
 0x2fb   : > { %838 = vst.msk [vmem:[%s1250_s15] sm:$0xff] %vm350_vm2, %v830_v2 }
 0x2ff   : > { %v808_v5 = vpop.permute.xlu1 %807 }
 0x300   : > { %v833_v8 = vmul.f32 %v808_v5, %v769_v10  ;;  %v798_v11 = vpop.permute.xlu0 %797 }
 0x301   : > { %v831_v13 = vmul.f32 %v798_v11, %v767_v27 }
 0x302   : > { %841 = vst.msk [vmem:[%s1250_s15 + $0x18] sm:$0xff] %vm350_vm2, %v833_v8 }
 0x303   : > { %839 = vst.msk [vmem:[%s1250_s15 + $0x8] sm:$0xff] %vm350_vm2, %v831_v13 }
 0x307   : > { %v828_v6 = vpop.permute.xlu1 %827 }
 0x308   : > { %v837_v7 = vmul.f32 %v828_v6, %v773_v15  ;;  %v823_v16 = vpop.permute.xlu0 %822 }
 0x309   : > { %v836_v18 = vmul.f32 %v823_v16, %v772_v3 }
 0x30a   : > { %845 = vst.msk [vmem:[%s1250_s15 + $0x38] sm:$0xff] %vm350_vm2, %v837_v7 }
 0x30b   : > { %844 = vst.msk [vmem:[%s1250_s15 + $0x30] sm:$0xff] %vm350_vm2, %v836_v18 }
 0x30c PF: > { %s17_s23 = sadd.s32 1, %s1160_s23   ;;  %s1497_s20 = smov %s1152_s1 }
 0x30d   : > { %p14_p9 = scmp.ge.s32.totalorder %s17_s23, 6   ;;  %s1498_s21 = smov %s1156_s22 }
 0x30e   : > { %s1499_s1 = smov %s1502_s0  ;;  %s1500_s22 = smov %s1506_s24 }
 0x30f   :  { %16 = sbr.rel (!%p14_p9) target bundleno = 3 (0x3), region = 76 }

</bundles_post_ra>
